<compile_context>
chip_gen: v6e
topology: v6e:2x2x1
jax: 0.10.0
libtpu: 0.0.40
codegen_flags: <defaults>
</compile_context>

<pallas_src>
import jax
import jax.numpy as jnp
import numpy as np
from jax.experimental import pallas as pl
from jax.experimental.pallas import tpu as pltpu


def _round_up(n, m):
    return ((n + m - 1) // m) * m


# ----------------------------- Pallas kernels ------------------------------ #

def _conv_pool_kernel(cols_ref, w_ref, b_ref, o_ref):
    """Fused conv-as-matmul + 2x2/2 maxpool + bias + ReLU.

    cols_ref: (Kp, 4*tm) bf16 im2col block; lanes ordered [tap0|tap1|tap2|tap3]
    w_ref:    (O, Kp)    bf16 conv weight (rows = out channels, K zero-padded)
    b_ref:    (O, 1)     f32 bias
    o_ref:    (O, tm)    bf16 pooled activation (M = B*Hp*Wp on the lane axis)
    """
    tm = o_ref.shape[-1]
    # Single wide MXU dot over all four pool taps (f32 accumulation).
    y = jnp.dot(w_ref[...], cols_ref[...], preferred_element_type=jnp.float32)
    # 2x2 max over the four aligned tm-wide lane slices.
    m = jnp.maximum(jnp.maximum(y[:, 0 * tm:1 * tm], y[:, 1 * tm:2 * tm]),
                    jnp.maximum(y[:, 2 * tm:3 * tm], y[:, 3 * tm:4 * tm]))
    # Bias + ReLU hoisted after the tap max (monotone, so identical result).
    o_ref[...] = jnp.maximum(m + b_ref[...], 0.0).astype(o_ref.dtype)


def conv_pool(cols2d, w, b, tm, ntiles, out_dtype=jnp.bfloat16):
    """(O,Kp) @ (Kp, 4*tm) per tile with fused pool/bias/ReLU, M-tiled grid."""
    O, Kp = w.shape
    return pl.pallas_call(
        _conv_pool_kernel,
        out_shape=jax.ShapeDtypeStruct((O, ntiles * tm), out_dtype),
        grid=(ntiles,),
        in_specs=[
            pl.BlockSpec((Kp, 4 * tm), lambda i: (0, i)),
            pl.BlockSpec((O, Kp), lambda i: (0, 0)),
            pl.BlockSpec((O, 1), lambda i: (0, 0)),
        ],
        out_specs=pl.BlockSpec((O, tm), lambda i: (0, i)),
        compiler_params=pltpu.CompilerParams(dimension_semantics=("parallel",)),
    )(cols2d, w, b)


def _fc_head_kernel(x_ref, w1_ref, b1_ref, w2_ref, b2_ref, w3_ref, b3_ref, o_ref):
    """fc1+ReLU -> fc2+ReLU -> fc3, fully resident in VMEM.

    bf16 MXU operands, f32 accumulation, 128-lane padded hidden/output widths.
    """
    h = jnp.dot(x_ref[...], w1_ref[...], preferred_element_type=jnp.float32) + b1_ref[...]
    h = jnp.maximum(h, 0.0).astype(jnp.bfloat16)
    h = jnp.dot(h, w2_ref[...], preferred_element_type=jnp.float32) + b2_ref[...]
    h = jnp.maximum(h, 0.0).astype(jnp.bfloat16)
    o = jnp.dot(h, w3_ref[...], preferred_element_type=jnp.float32) + b3_ref[...]
    o_ref[...] = o.astype(o_ref.dtype)


def fc_head(x, w1, b1, w2, b2, w3, b3):
    B = x.shape[0]
    N = w3.shape[1]

    def full(shape):
        n = len(shape)
        return pl.BlockSpec(shape, lambda i, _n=n: (0,) * _n)

    args = (x, w1, b1, w2, b2, w3, b3)
    return pl.pallas_call(
        _fc_head_kernel,
        out_shape=jax.ShapeDtypeStruct((B, N), jnp.float32),
        grid=(1,),
        in_specs=[full(a.shape) for a in args],
        out_specs=full((B, N)),
    )(*args)


# ------------------------------- JAX glue ---------------------------------- #

def _pooled_patches(x_cbhw, kh, kw, k_pad, max_tile=1024):
    """Patch extraction for VALID conv + 2x2/2 pool (pure-JAX layout glue).

    x_cbhw: (C, B, H, W) -> cols2d (k_pad, ntiles*4*tm), lane-ordered
    tile-major then pool-tap then within-tile column; K rows are (c, di, dj)
    to match an OIHW weight reshape, columns are (b, i, j). Zero-padded so the
    kernel sees aligned, lane-dense blocks and >=2 parallel tiles when M is big
    enough (v7x megacore).
    """
    C, B, H, W = x_cbhw.shape
    Ho, Wo = H - kh + 1, W - kw + 1
    Hp, Wp = Ho // 2, Wo // 2
    M = B * Hp * Wp
    K = C * kh * kw

    m128 = _round_up(M, 128)
    if m128 <= 128:
        tm = 128                                    # tiny stage: single block
    else:
        tm = min(max_tile, _round_up(m128 // 2, 128))
    mpad = _round_up(M, tm)
    ntiles = mpad // tm

    pats = [x_cbhw[:, :, di:di + Ho, dj:dj + Wo]
            for di in range(kh) for dj in range(kw)]          # each (C,B,Ho,Wo)
    pt = jnp.stack(pats, axis=1)                              # (C, kh*kw, B, Ho, Wo)
    taps = [pt[:, :, :, p::2, q::2].reshape(K, M)             # (K, M) per pool tap
            for p in range(2) for q in range(2)]
    cols = jnp.stack(taps, axis=0)                            # (4, K, M)
    cols = jnp.pad(cols, ((0, 0), (0, k_pad - K), (0, mpad - M)))
    cols = (cols.reshape(4, k_pad, ntiles, tm)
                .transpose(1, 2, 0, 3)
                .reshape(k_pad, ntiles * 4 * tm))
    return cols, (Hp, Wp, M, tm, ntiles)


def prep_params(params):
    """One-time (outside jit) repack: reshapes/transposes/pads/casts hoisted."""
    def pad_to(a, shape):
        return jnp.pad(a, [(0, s - d) for d, s in zip(a.shape, shape)])

    c1w = params["conv1_w"].reshape(6, -1)    # (6, 75)
    c2w = params["conv2_w"].reshape(16, -1)   # (16, 150)
    return {
        "conv1_w": pad_to(c1w, (6, 80)).astype(jnp.bfloat16),
        "conv1_b": params["conv1_b"].reshape(6, 1).astype(jnp.float32),
        "conv2_w": pad_to(c2w, (16, 160)).astype(jnp.bfloat16),
        "conv2_b": params["conv2_b"].reshape(16, 1).astype(jnp.float32),
        "fc1_wt": pad_to(params["fc1_w"].T, (400, 128)).astype(jnp.bfloat16),
        "fc1_b": pad_to(params["fc1_b"].reshape(1, -1), (1, 128)).astype(jnp.float32),
        "fc2_wt": pad_to(params["fc2_w"].T, (128, 128)).astype(jnp.bfloat16),
        "fc2_b": pad_to(params["fc2_b"].reshape(1, -1), (1, 128)).astype(jnp.float32),
        "fc3_wt": pad_to(params["fc3_w"].T, (128, 128)).astype(jnp.bfloat16),
        "fc3_b": pad_to(params["fc3_b"].reshape(1, -1), (1, 128)).astype(jnp.float32),
    }


def net_forward(p, x):
    """x: (B, 3, 32, 32) NCHW f32 -> logits (B, 10) f32."""
    B = x.shape[0]
    a = x.astype(jnp.bfloat16).transpose(1, 0, 2, 3)                  # (3, B, 32, 32)

    cols, (hp, wp, M, tm, nt) = _pooled_patches(a, 5, 5, 80)          # (80, nt*4*tm)
    a = conv_pool(cols, p["conv1_w"], p["conv1_b"], tm, nt)           # (6, nt*tm) bf16
    a = a[:, :M].reshape(6, B, hp, wp)                                # (6, B, 14, 14)

    cols, (hp, wp, M, tm, nt) = _pooled_patches(a, 5, 5, 160)         # (160, 512)
    a = conv_pool(cols, p["conv2_w"], p["conv2_b"], tm, nt)           # (16, 128) bf16

    # flatten in torch's (c, h, w) order -> (B, 400), stays bf16
    a = a[:, :M].reshape(16, B, hp * wp).transpose(1, 0, 2).reshape(B, 16 * hp * wp)
    logits = fc_head(a, p["fc1_wt"], p["fc1_b"], p["fc2_wt"], p["fc2_b"],
                     p["fc3_wt"], p["fc3_b"])                         # (B, 128) f32
    return logits[:, :10]


# --------------------------- pure-JAX reference ----------------------------- #

def net_forward_ref(params, x):
    def conv(x, w, b):
        y = jax.lax.conv_general_dilated(
            x, w, window_strides=(1, 1), padding="VALID",
            dimension_numbers=("NCHW", "OIHW", "NCHW"))
        return jax.nn.relu(y + b[None, :, None, None])

    def pool(x):
        return jax.lax.reduce_window(x, -jnp.inf, jax.lax.max,
                                     (1, 1, 2, 2), (1, 1, 2, 2), "VALID")

    x = pool(conv(x, params["conv1_w"], params["conv1_b"]))
    x = pool(conv(x, params["conv2_w"], params["conv2_b"]))
    x = x.reshape(x.shape[0], -1)
    x = jax.nn.relu(x @ params["fc1_w"].T + params["fc1_b"])
    x = jax.nn.relu(x @ params["fc2_w"].T + params["fc2_b"])
    return x @ params["fc3_w"].T + params["fc3_b"]


# --------------------------------- main ------------------------------------ #

def init_params(key):
    def uinit(key, shape, fan_in):
        bound = 1.0 / np.sqrt(fan_in)
        return jax.random.uniform(key, shape, jnp.float32, -bound, bound)

    ks = jax.random.split(key, 10)
    return {
        "conv1_w": uinit(ks[0], (6, 3, 5, 5), 3 * 5 * 5),
        "conv1_b": uinit(ks[1], (6,), 3 * 5 * 5),
        "conv2_w": uinit(ks[2], (16, 6, 5, 5), 6 * 5 * 5),
        "conv2_b": uinit(ks[3], (16,), 6 * 5 * 5),
        "fc1_w": uinit(ks[4], (120, 400), 400),
        "fc1_b": uinit(ks[5], (120,), 400),
        "fc2_w": uinit(ks[6], (84, 120), 120),
        "fc2_b": uinit(ks[7], (84,), 120),
        "fc3_w": uinit(ks[8], (10, 84), 84),
        "fc3_b": uinit(ks[9], (10,), 84),
    }


if __name__ == "__main__":
    key = jax.random.PRNGKey(0)
    pkey, xkey = jax.random.split(key)
    params = init_params(pkey)
    # Input must be (B, 3, 32, 32) for the 16*5*5 flatten to hold (CIFAR-sized).
    x = jax.random.normal(xkey, (2, 3, 32, 32), dtype=jnp.float32)

    kparams = prep_params(params)   # one-time repack, outside the jitted forward

    out = jax.jit(net_forward)(kparams, x)
    out = jax.block_until_ready(out)
    assert out.shape == (2, 10) and out.dtype == jnp.float32

    ref = jax.block_until_ready(jax.jit(net_forward_ref)(params, x))
    np.testing.assert_allclose(np.asarray(out), np.asarray(ref), rtol=2e-2, atol=2e-2)

    print("KERNEL_OK")
</pallas_src>

<mosaic_0001>
module attributes {stable_mosaic.version = 11 : i64} {
  func.func @_conv_pool_kernel(%arg0: i32, %arg1: memref<80x1024xbf16, #tpu.memory_space<vmem>>, %arg2: memref<6x80xbf16, #tpu.memory_space<vmem>>, %arg3: memref<6x1xf32, #tpu.memory_space<vmem>>, %arg4: memref<6x256xbf16, #tpu.memory_space<vmem>>) attributes {dimension_semantics = [#tpu.dimension_semantics<parallel>], iteration_bounds = array<i64: 2>, scalar_prefetch = 0 : i64, scratch_operands = 0 : i64, tpu.core_type = #tpu.core_type<tc>, window_params = [{transform_indices = @transform_0, window_bounds = array<i64: 80, 1024>}, {pipeline_mode = #tpu.pipeline_mode<synchronous>, transform_indices = @transform_1, window_bounds = array<i64: 6, 80>}, {pipeline_mode = #tpu.pipeline_mode<synchronous>, transform_indices = @transform_2, window_bounds = array<i64: 6, 1>}, {transform_indices = @transform_3, window_bounds = array<i64: 6, 256>}]} {
    %c0 = arith.constant 0 : index
    %c0_0 = arith.constant 0 : index
    %0 = vector.load %arg2[%c0, %c0_0] : memref<6x80xbf16, #tpu.memory_space<vmem>>, vector<6x80xbf16>
    %c0_1 = arith.constant 0 : index
    %c0_2 = arith.constant 0 : index
    %1 = vector.load %arg1[%c0_1, %c0_2] : memref<80x1024xbf16, #tpu.memory_space<vmem>>, vector<80x1024xbf16>
    %cst = arith.constant dense<0.000000e+00> : vector<6x1024xf32>
    %2 = tpu.matmul %0, %1, %cst {dimension_numbers = #tpu.dot_dimension_numbers<[1], [0], [0], [1], [0, 0, 1, 1], [], []>} : vector<6x80xbf16>, vector<80x1024xbf16>, vector<6x1024xf32> -> vector<6x1024xf32>
    %3 = vector.extract_strided_slice %2 {offsets = [0, 0], sizes = [6, 256], strides = [1, 1]} : vector<6x1024xf32> to vector<6x256xf32>
    %4 = vector.extract_strided_slice %2 {offsets = [0, 256], sizes = [6, 256], strides = [1, 1]} : vector<6x1024xf32> to vector<6x256xf32>
    %5 = arith.maximumf %3, %4 : vector<6x256xf32>
    %6 = vector.extract_strided_slice %2 {offsets = [0, 512], sizes = [6, 256], strides = [1, 1]} : vector<6x1024xf32> to vector<6x256xf32>
    %7 = vector.extract_strided_slice %2 {offsets = [0, 768], sizes = [6, 256], strides = [1, 1]} : vector<6x1024xf32> to vector<6x256xf32>
    %8 = arith.maximumf %6, %7 : vector<6x256xf32>
    %9 = arith.maximumf %5, %8 : vector<6x256xf32>
    %c0_3 = arith.constant 0 : index
    %c0_4 = arith.constant 0 : index
    %10 = vector.load %arg3[%c0_3, %c0_4] : memref<6x1xf32, #tpu.memory_space<vmem>>, vector<6x1xf32>
    %11 = vector.broadcast %10 : vector<6x1xf32> to vector<6x256xf32>
    %12 = arith.addf %9, %11 : vector<6x256xf32>
    %cst_5 = arith.constant 0.000000e+00 : f32
    %13 = vector.broadcast %cst_5 : f32 to vector<6x256xf32>
    %14 = arith.maximumf %12, %13 : vector<6x256xf32>
    %15 = arith.truncf %14 : vector<6x256xf32> to vector<6x256xbf16>
    %c0_6 = arith.constant 0 : index
    %c0_7 = arith.constant 0 : index
    %16 = vector.load %arg4[%c0_6, %c0_7] : memref<6x256xbf16, #tpu.memory_space<vmem>>, vector<6x256xbf16>
    tpu.vector_store %arg4[%c0_6, %c0_7], %15 {strides = array<i32>} : memref<6x256xbf16, #tpu.memory_space<vmem>>, vector<6x256xbf16>,
    return
  }
  func.func @transform_0(%arg0: i32) -> (i32, i32) {
    %c0_i32 = arith.constant 0 : i32
    %c0_i32_0 = arith.constant 0 : i32
    return %c0_i32, %arg0 : i32, i32
  }
  func.func @transform_1(%arg0: i32) -> (i32, i32) {
    %c0_i32 = arith.constant 0 : i32
    %c0_i32_0 = arith.constant 0 : i32
    %c0_i32_1 = arith.constant 0 : i32
    return %c0_i32, %c0_i32_0 : i32, i32
  }
  func.func @transform_2(%arg0: i32) -> (i32, i32) {
    %c0_i32 = arith.constant 0 : i32
    %c0_i32_0 = arith.constant 0 : i32
    %c0_i32_1 = arith.constant 0 : i32
    return %c0_i32, %c0_i32_0 : i32, i32
  }
  func.func @transform_3(%arg0: i32) -> (i32, i32) {
    %c0_i32 = arith.constant 0 : i32
    %c0_i32_0 = arith.constant 0 : i32
    return %c0_i32, %arg0 : i32, i32
  }
}

module attributes {stable_mosaic.version = 11 : i64} {
  func.func @_conv_pool_kernel(%arg0: i32, %arg1: memref<160x512xbf16, #tpu.memory_space<vmem>>, %arg2: memref<16x160xbf16, #tpu.memory_space<vmem>>, %arg3: memref<16x1xf32, #tpu.memory_space<vmem>>, %arg4: memref<16x128xbf16, #tpu.memory_space<vmem>>) attributes {dimension_semantics = [#tpu.dimension_semantics<parallel>], iteration_bounds = array<i64: 1>, scalar_prefetch = 0 : i64, scratch_operands = 0 : i64, tpu.core_type = #tpu.core_type<tc>, window_params = [{transform_indices = @transform_0, window_bounds = array<i64: 160, 512>}, {pipeline_mode = #tpu.pipeline_mode<synchronous>, transform_indices = @transform_1, window_bounds = array<i64: 16, 160>}, {pipeline_mode = #tpu.pipeline_mode<synchronous>, transform_indices = @transform_2, window_bounds = array<i64: 16, 1>}, {transform_indices = @transform_3, window_bounds = array<i64: 16, 128>}]} {
    %c0 = arith.constant 0 : index
    %c0_0 = arith.constant 0 : index
    %0 = vector.load %arg2[%c0, %c0_0] : memref<16x160xbf16, #tpu.memory_space<vmem>>, vector<16x160xbf16>
    %c0_1 = arith.constant 0 : index
    %c0_2 = arith.constant 0 : index
    %1 = vector.load %arg1[%c0_1, %c0_2] : memref<160x512xbf16, #tpu.memory_space<vmem>>, vector<160x512xbf16>
    %cst = arith.constant dense<0.000000e+00> : vector<16x512xf32>
    %2 = tpu.matmul %0, %1, %cst {dimension_numbers = #tpu.dot_dimension_numbers<[1], [0], [0], [1], [0, 0, 1, 1], [], []>} : vector<16x160xbf16>, vector<160x512xbf16>, vector<16x512xf32> -> vector<16x512xf32>
    %3 = vector.extract_strided_slice %2 {offsets = [0, 0], sizes = [16, 128], strides = [1, 1]} : vector<16x512xf32> to vector<16x128xf32>
    %4 = vector.extract_strided_slice %2 {offsets = [0, 128], sizes = [16, 128], strides = [1, 1]} : vector<16x512xf32> to vector<16x128xf32>
    %5 = arith.maximumf %3, %4 : vector<16x128xf32>
    %6 = vector.extract_strided_slice %2 {offsets = [0, 256], sizes = [16, 128], strides = [1, 1]} : vector<16x512xf32> to vector<16x128xf32>
    %7 = vector.extract_strided_slice %2 {offsets = [0, 384], sizes = [16, 128], strides = [1, 1]} : vector<16x512xf32> to vector<16x128xf32>
    %8 = arith.maximumf %6, %7 : vector<16x128xf32>
    %9 = arith.maximumf %5, %8 : vector<16x128xf32>
    %c0_3 = arith.constant 0 : index
    %c0_4 = arith.constant 0 : index
    %10 = vector.load %arg3[%c0_3, %c0_4] : memref<16x1xf32, #tpu.memory_space<vmem>>, vector<16x1xf32>
    %11 = vector.broadcast %10 : vector<16x1xf32> to vector<16x128xf32>
    %12 = arith.addf %9, %11 : vector<16x128xf32>
    %cst_5 = arith.constant 0.000000e+00 : f32
    %13 = vector.broadcast %cst_5 : f32 to vector<16x128xf32>
    %14 = arith.maximumf %12, %13 : vector<16x128xf32>
    %15 = arith.truncf %14 : vector<16x128xf32> to vector<16x128xbf16>
    %c0_6 = arith.constant 0 : index
    %c0_7 = arith.constant 0 : index
    %16 = vector.load %arg4[%c0_6, %c0_7] : memref<16x128xbf16, #tpu.memory_space<vmem>>, vector<16x128xbf16>
    tpu.vector_store %arg4[%c0_6, %c0_7], %15 {strides = array<i32>} : memref<16x128xbf16, #tpu.memory_space<vmem>>, vector<16x128xbf16>,
    return
  }
  func.func @transform_0(%arg0: i32) -> (i32, i32) {
    %c0_i32 = arith.constant 0 : i32
    %c0_i32_0 = arith.constant 0 : i32
    return %c0_i32, %arg0 : i32, i32
  }
  func.func @transform_1(%arg0: i32) -> (i32, i32) {
    %c0_i32 = arith.constant 0 : i32
    %c0_i32_0 = arith.constant 0 : i32
    %c0_i32_1 = arith.constant 0 : i32
    return %c0_i32, %c0_i32_0 : i32, i32
  }
  func.func @transform_2(%arg0: i32) -> (i32, i32) {
    %c0_i32 = arith.constant 0 : i32
    %c0_i32_0 = arith.constant 0 : i32
    %c0_i32_1 = arith.constant 0 : i32
    return %c0_i32, %c0_i32_0 : i32, i32
  }
  func.func @transform_3(%arg0: i32) -> (i32, i32) {
    %c0_i32 = arith.constant 0 : i32
    %c0_i32_0 = arith.constant 0 : i32
    return %c0_i32, %arg0 : i32, i32
  }
}

module attributes {stable_mosaic.version = 11 : i64} {
  func.func @_fc_head_kernel(%arg0: i32, %arg1: memref<2x400xbf16, #tpu.memory_space<vmem>>, %arg2: memref<400x128xbf16, #tpu.memory_space<vmem>>, %arg3: memref<1x128xf32, #tpu.memory_space<vmem>>, %arg4: memref<128x128xbf16, #tpu.memory_space<vmem>>, %arg5: memref<1x128xf32, #tpu.memory_space<vmem>>, %arg6: memref<128x128xbf16, #tpu.memory_space<vmem>>, %arg7: memref<1x128xf32, #tpu.memory_space<vmem>>, %arg8: memref<2x128xf32, #tpu.memory_space<vmem>>) attributes {dimension_semantics = [#tpu.dimension_semantics<arbitrary>], iteration_bounds = array<i64: 1>, scalar_prefetch = 0 : i64, scratch_operands = 0 : i64, tpu.core_type = #tpu.core_type<tc>, window_params = [{pipeline_mode = #tpu.pipeline_mode<synchronous>, transform_indices = @transform_0, window_bounds = array<i64: 2, 400>}, {pipeline_mode = #tpu.pipeline_mode<synchronous>, transform_indices = @transform_1, window_bounds = array<i64: 400, 128>}, {pipeline_mode = #tpu.pipeline_mode<synchronous>, transform_indices = @transform_2, window_bounds = array<i64: 1, 128>}, {pipeline_mode = #tpu.pipeline_mode<synchronous>, transform_indices = @transform_3, window_bounds = array<i64: 128, 128>}, {pipeline_mode = #tpu.pipeline_mode<synchronous>, transform_indices = @transform_4, window_bounds = array<i64: 1, 128>}, {pipeline_mode = #tpu.pipeline_mode<synchronous>, transform_indices = @transform_5, window_bounds = array<i64: 128, 128>}, {pipeline_mode = #tpu.pipeline_mode<synchronous>, transform_indices = @transform_6, window_bounds = array<i64: 1, 128>}, {pipeline_mode = #tpu.pipeline_mode<synchronous>, transform_indices = @transform_7, window_bounds = array<i64: 2, 128>}]} {
    %c0 = arith.constant 0 : index
    %c0_0 = arith.constant 0 : index
    %0 = vector.load %arg1[%c0, %c0_0] : memref<2x400xbf16, #tpu.memory_space<vmem>>, vector<2x400xbf16>
    %c0_1 = arith.constant 0 : index
    %c0_2 = arith.constant 0 : index
    %1 = vector.load %arg2[%c0_1, %c0_2] : memref<400x128xbf16, #tpu.memory_space<vmem>>, vector<400x128xbf16>
    %cst = arith.constant dense<0.000000e+00> : vector<2x128xf32>
    %2 = tpu.matmul %0, %1, %cst {dimension_numbers = #tpu.dot_dimension_numbers<[1], [0], [0], [1], [0, 0, 1, 1], [], []>} : vector<2x400xbf16>, vector<400x128xbf16>, vector<2x128xf32> -> vector<2x128xf32>
    %c0_3 = arith.constant 0 : index
    %c0_4 = arith.constant 0 : index
    %3 = vector.load %arg3[%c0_3, %c0_4] : memref<1x128xf32, #tpu.memory_space<vmem>>, vector<1x128xf32>
    %4 = vector.broadcast %3 : vector<1x128xf32> to vector<2x128xf32>
    %5 = arith.addf %2, %4 : vector<2x128xf32>
    %cst_5 = arith.constant 0.000000e+00 : f32
    %6 = vector.broadcast %cst_5 : f32 to vector<2x128xf32>
    %7 = arith.maximumf %5, %6 : vector<2x128xf32>
    %8 = arith.truncf %7 : vector<2x128xf32> to vector<2x128xbf16>
    %c0_6 = arith.constant 0 : index
    %c0_7 = arith.constant 0 : index
    %9 = vector.load %arg4[%c0_6, %c0_7] : memref<128x128xbf16, #tpu.memory_space<vmem>>, vector<128x128xbf16>
    %cst_8 = arith.constant dense<0.000000e+00> : vector<2x128xf32>
    %10 = tpu.matmul %8, %9, %cst_8 {dimension_numbers = #tpu.dot_dimension_numbers<[1], [0], [0], [1], [0, 0, 1, 1], [], []>} : vector<2x128xbf16>, vector<128x128xbf16>, vector<2x128xf32> -> vector<2x128xf32>
    %c0_9 = arith.constant 0 : index
    %c0_10 = arith.constant 0 : index
    %11 = vector.load %arg5[%c0_9, %c0_10] : memref<1x128xf32, #tpu.memory_space<vmem>>, vector<1x128xf32>
    %12 = vector.broadcast %11 : vector<1x128xf32> to vector<2x128xf32>
    %13 = arith.addf %10, %12 : vector<2x128xf32>
    %cst_11 = arith.constant 0.000000e+00 : f32
    %14 = vector.broadcast %cst_11 : f32 to vector<2x128xf32>
    %15 = arith.maximumf %13, %14 : vector<2x128xf32>
    %16 = arith.truncf %15 : vector<2x128xf32> to vector<2x128xbf16>
    %c0_12 = arith.constant 0 : index
    %c0_13 = arith.constant 0 : index
    %17 = vector.load %arg6[%c0_12, %c0_13] : memref<128x128xbf16, #tpu.memory_space<vmem>>, vector<128x128xbf16>
    %cst_14 = arith.constant dense<0.000000e+00> : vector<2x128xf32>
    %18 = tpu.matmul %16, %17, %cst_14 {dimension_numbers = #tpu.dot_dimension_numbers<[1], [0], [0], [1], [0, 0, 1, 1], [], []>} : vector<2x128xbf16>, vector<128x128xbf16>, vector<2x128xf32> -> vector<2x128xf32>
    %c0_15 = arith.constant 0 : index
    %c0_16 = arith.constant 0 : index
    %19 = vector.load %arg7[%c0_15, %c0_16] : memref<1x128xf32, #tpu.memory_space<vmem>>, vector<1x128xf32>
    %20 = vector.broadcast %19 : vector<1x128xf32> to vector<2x128xf32>
    %21 = arith.addf %18, %20 : vector<2x128xf32>
    %c0_17 = arith.constant 0 : index
    %c0_18 = arith.constant 0 : index
    %22 = vector.load %arg8[%c0_17, %c0_18] : memref<2x128xf32, #tpu.memory_space<vmem>>, vector<2x128xf32>
    tpu.vector_store %arg8[%c0_17, %c0_18], %21 {strides = array<i32>} : memref<2x128xf32, #tpu.memory_space<vmem>>, vector<2x128xf32>,
    return
  }
  func.func @transform_0(%arg0: i32) -> (i32, i32) {
    %c0_i32 = arith.constant 0 : i32
    %c0_i32_0 = arith.constant 0 : i32
    %c0_i32_1 = arith.constant 0 : i32
    return %c0_i32, %c0_i32_0 : i32, i32
  }
  func.func @transform_1(%arg0: i32) -> (i32, i32) {
    %c0_i32 = arith.constant 0 : i32
    %c0_i32_0 = arith.constant 0 : i32
    %c0_i32_1 = arith.constant 0 : i32
    return %c0_i32, %c0_i32_0 : i32, i32
  }
  func.func @transform_2(%arg0: i32) -> (i32, i32) {
    %c0_i32 = arith.constant 0 : i32
    %c0_i32_0 = arith.constant 0 : i32
    %c0_i32_1 = arith.constant 0 : i32
    return %c0_i32, %c0_i32_0 : i32, i32
  }
  func.func @transform_3(%arg0: i32) -> (i32, i32) {
    %c0_i32 = arith.constant 0 : i32
    %c0_i32_0 = arith.constant 0 : i32
    %c0_i32_1 = arith.constant 0 : i32
    return %c0_i32, %c0_i32_0 : i32, i32
  }
  func.func @transform_4(%arg0: i32) -> (i32, i32) {
    %c0_i32 = arith.constant 0 : i32
    %c0_i32_0 = arith.constant 0 : i32
    %c0_i32_1 = arith.constant 0 : i32
    return %c0_i32, %c0_i32_0 : i32, i32
  }
  func.func @transform_5(%arg0: i32) -> (i32, i32) {
    %c0_i32 = arith.constant 0 : i32
    %c0_i32_0 = arith.constant 0 : i32
    %c0_i32_1 = arith.constant 0 : i32
    return %c0_i32, %c0_i32_0 : i32, i32
  }
  func.func @transform_6(%arg0: i32) -> (i32, i32) {
    %c0_i32 = arith.constant 0 : i32
    %c0_i32_0 = arith.constant 0 : i32
    %c0_i32_1 = arith.constant 0 : i32
    return %c0_i32, %c0_i32_0 : i32, i32
  }
  func.func @transform_7(%arg0: i32) -> (i32, i32) {
    %c0_i32 = arith.constant 0 : i32
    %c0_i32_0 = arith.constant 0 : i32
    %c0_i32_1 = arith.constant 0 : i32
    return %c0_i32, %c0_i32_0 : i32, i32
  }
}

</mosaic_0001>

<bundles_post_ra>
// kernel: net_forward.3
= control target key start
LH: loop header
LB: loop body
LE: loop exit
PB: predicated region body
PF: predicated region fallthrough
CT: control target
= control target key end

     0   :  { %s899_s12 = smov 0   ;;  %s901_s13 = smov 0   ;;  %s1092_s0 = inlined_call_operand.vmem [shape: bf16[80,2048], index: 0, kind: input, shape index: {}]   ;;  %s1093_s1 = inlined_call_operand.vmem [shape: bf16[6,80], index: 1, kind: input, shape index: {}]   ;;  %s1094_s2 = inlined_call_operand.vmem [shape: f32[6,1], index: 2, kind: input, shape index: {}]   ;;  %s1095_s3 = inlined_call_operand.vmem [shape: bf16[6,512], index: 3, kind: output, shape index: {}]  }
   0x1   :  { %s903_s14 = smov 0  }
   0x2 LB: > { %s768_s15 = sadd.s32 4294967295, %s876_s14   ;;  %s916_s16 = sadd.s32 1, %s876_s14   ;;  %s876_s14 = sphi %s903_s14, %s1098_s14   ;;  %s872_s13 = sphi %s901_s13, %s1097_s13   ;;  %s868_s12 = sphi %s899_s12, %s1096_s12  }
   0x3   : > { %s17_s17 = ssub.s32 %s876_s14, %s916_s16  ;;  %s20_s18 = sadd.s32 1, %s872_s13 }
   0x4   : > { %p18_p0 = scmp.eq.s32.totalorder %s17_s17, 0  ;;  %p27_p1 = scmp.ne.s32.totalorder %s872_s13, %s868_s12 }
   0x5   : > { %p28_p2 = scmp.eq.s32.totalorder %s876_s14, 0  ;;  %p771_p4 = scmp.ge.s32.totalorder %s876_s14, 2 }
   0x6   : > { %s925_s19 = scalar_select %p18_p0, %s872_s13, %s20_s18  }
   0x7   : > { %p29_p3 = por %p28_p2, %p27_p1  ;;  %127 = sbr.rel (%p771_p4) target bundleno = 37 (0x25), region = 24 }
   0xc   : > { %130 = sbr.rel (!%p29_p3) target bundleno = 37 (0x25), region = 28  ;;  %s132_s20 = sand.u32 (%p29_p3), 1, %s872_s13  }
   0xd   : > { %s824_s21 = sshll.u32 (%p29_p3), %s876_s14, 5  ;;  %s826_s22 = smul.u32 (%p29_p3), 320, %s132_s20 }
   0xe   : > { %s933_s25 = scalar_lea.vmem (%p29_p3), %s1092_s0, %s824_s21 }
   0xf   : > { %v150_v0 = vld [vmem:[%s933_s25] sm:$0xff] (%p29_p3)  ;;  %v152_v1 = vld [vmem:[%s933_s25 + $0x8] sm:$0xff] (%p29_p3)  ;;  %v154_v2 = vld [vmem:[%s933_s25 + $0x10] sm:$0xff] (%p29_p3)  ;;  %s941_s26 = scalar_lea.vmem (%p29_p3), [#allocation2], %s826_s22 }
  0x10   : > { %v156_v3 = vld [vmem:[%s933_s25 + $0x18] sm:$0xff] (%p29_p3)  ;;  %v158_v4 = vld [vmem:[%s933_s25 + $0x40] sm:$0xff] (%p29_p3)  ;;  %v160_v5 = vld [vmem:[%s933_s25 + $0x48] sm:$0xff] (%p29_p3)  ;;  %151 = vst [vmem:[%s941_s26] sm:$0xff] (%p29_p3), %v150_v0 }
  0x11   : > { %153 = vst [vmem:[%s941_s26 + $0x8] sm:$0xff] %v152_v1  ;;  %155 = vst [vmem:[%s941_s26 + $0x10] sm:$0xff] %v154_v2  ;;  %v162_v6 = vld [vmem:[%s933_s25 + $0x50] sm:$0xff]  ;;  %v164_v7 = vld [vmem:[%s933_s25 + $0x58] sm:$0xff] }
  0x12   : > { %157 = vst [vmem:[%s941_s26 + $0x18] sm:$0xff] %v156_v3  ;;  %159 = vst [vmem:[%s941_s26 + $0x20] sm:$0xff] %v158_v4  ;;  %v166_v8 = vld [vmem:[%s933_s25 + $0x80] sm:$0xff]  ;;  %v168_v9 = vld [vmem:[%s933_s25 + $0x88] sm:$0xff] }
  0x13   : > { %161 = vst [vmem:[%s941_s26 + $0x28] sm:$0xff] %v160_v5  ;;  %163 = vst [vmem:[%s941_s26 + $0x30] sm:$0xff] %v162_v6  ;;  %v170_v10 = vld [vmem:[%s933_s25 + $0x90] sm:$0xff]  ;;  %v172_v11 = vld [vmem:[%s933_s25 + $0x98] sm:$0xff] }
  0x14   : > { %165 = vst [vmem:[%s941_s26 + $0x38] sm:$0xff] %v164_v7  ;;  %167 = vst [vmem:[%s941_s26 + $0x40] sm:$0xff] %v166_v8  ;;  %v174_v12 = vld [vmem:[%s933_s25 + $0xc0] sm:$0xff]  ;;  %v176_v13 = vld [vmem:[%s933_s25 + $0xc8] sm:$0xff] }
  0x15   : > { %169 = vst [vmem:[%s941_s26 + $0x48] sm:$0xff] %v168_v9  ;;  %171 = vst [vmem:[%s941_s26 + $0x50] sm:$0xff] %v170_v10  ;;  %v178_v14 = vld [vmem:[%s933_s25 + $0xd0] sm:$0xff]  ;;  %v180_v15 = vld [vmem:[%s933_s25 + $0xd8] sm:$0xff] }
  0x16   : > { %173 = vst [vmem:[%s941_s26 + $0x58] sm:$0xff] %v172_v11  ;;  %175 = vst [vmem:[%s941_s26 + $0x60] sm:$0xff] %v174_v12  ;;  %v182_v16 = vld [vmem:[%s933_s25 + $0x100] sm:$0xff]  ;;  %v184_v17 = vld [vmem:[%s933_s25 + $0x108] sm:$0xff] }
  0x17   : > { %177 = vst [vmem:[%s941_s26 + $0x68] sm:$0xff] %v176_v13  ;;  %179 = vst [vmem:[%s941_s26 + $0x70] sm:$0xff] %v178_v14  ;;  %v186_v18 = vld [vmem:[%s933_s25 + $0x110] sm:$0xff]  ;;  %v188_v19 = vld [vmem:[%s933_s25 + $0x118] sm:$0xff] }
  0x18   : > { %181 = vst [vmem:[%s941_s26 + $0x78] sm:$0xff] %v180_v15  ;;  %183 = vst [vmem:[%s941_s26 + $0x80] sm:$0xff] %v182_v16  ;;  %v190_v20 = vld [vmem:[%s933_s25 + $0x140] sm:$0xff]  ;;  %v192_v21 = vld [vmem:[%s933_s25 + $0x148] sm:$0xff] }
  0x19   : > { %185 = vst [vmem:[%s941_s26 + $0x88] sm:$0xff] %v184_v17  ;;  %187 = vst [vmem:[%s941_s26 + $0x90] sm:$0xff] %v186_v18  ;;  %v194_v22 = vld [vmem:[%s933_s25 + $0x150] sm:$0xff]  ;;  %v196_v23 = vld [vmem:[%s933_s25 + $0x158] sm:$0xff] }
  0x1a   : > { %189 = vst [vmem:[%s941_s26 + $0x98] sm:$0xff] %v188_v19  ;;  %191 = vst [vmem:[%s941_s26 + $0xa0] sm:$0xff] %v190_v20  ;;  %v198_v24 = vld [vmem:[%s933_s25 + $0x180] sm:$0xff]  ;;  %v200_v25 = vld [vmem:[%s933_s25 + $0x188] sm:$0xff] }
  0x1b   : > { %193 = vst [vmem:[%s941_s26 + $0xa8] sm:$0xff] %v192_v21  ;;  %195 = vst [vmem:[%s941_s26 + $0xb0] sm:$0xff] %v194_v22  ;;  %v202_v26 = vld [vmem:[%s933_s25 + $0x190] sm:$0xff]  ;;  %v204_v27 = vld [vmem:[%s933_s25 + $0x198] sm:$0xff] }
  0x1c   : > { %197 = vst [vmem:[%s941_s26 + $0xb8] sm:$0xff] %v196_v23  ;;  %199 = vst [vmem:[%s941_s26 + $0xc0] sm:$0xff] %v198_v24  ;;  %v206_v28 = vld [vmem:[%s933_s25 + $0x1c0] sm:$0xff]  ;;  %v208_v29 = vld [vmem:[%s933_s25 + $0x1c8] sm:$0xff] }
  0x1d   : > { %201 = vst [vmem:[%s941_s26 + $0xc8] sm:$0xff] %v200_v25  ;;  %203 = vst [vmem:[%s941_s26 + $0xd0] sm:$0xff] %v202_v26  ;;  %v210_v30 = vld [vmem:[%s933_s25 + $0x1d0] sm:$0xff]  ;;  %v212_v31 = vld [vmem:[%s933_s25 + $0x1d8] sm:$0xff] }
  0x1e   : > { %205 = vst [vmem:[%s941_s26 + $0xd8] sm:$0xff] %v204_v27  ;;  %207 = vst [vmem:[%s941_s26 + $0xe0] sm:$0xff] %v206_v28  ;;  %v214_v32 = vld [vmem:[%s933_s25 + $0x200] sm:$0xff]  ;;  %v216_v33 = vld [vmem:[%s933_s25 + $0x208] sm:$0xff] }
  0x1f   : > { %209 = vst [vmem:[%s941_s26 + $0xe8] sm:$0xff] %v208_v29  ;;  %211 = vst [vmem:[%s941_s26 + $0xf0] sm:$0xff] %v210_v30  ;;  %v218_v34 = vld [vmem:[%s933_s25 + $0x210] sm:$0xff]  ;;  %v220_v35 = vld [vmem:[%s933_s25 + $0x218] sm:$0xff] }
  0x20   : > { %213 = vst [vmem:[%s941_s26 + $0xf8] sm:$0xff] %v212_v31  ;;  %215 = vst [vmem:[%s941_s26 + $0x100] sm:$0xff] %v214_v32  ;;  %v222_v36 = vld [vmem:[%s933_s25 + $0x240] sm:$0xff]  ;;  %v224_v37 = vld [vmem:[%s933_s25 + $0x248] sm:$0xff] }
  0x21   : > { %217 = vst [vmem:[%s941_s26 + $0x108] sm:$0xff] %v216_v33  ;;  %219 = vst [vmem:[%s941_s26 + $0x110] sm:$0xff] %v218_v34  ;;  %v226_v38 = vld [vmem:[%s933_s25 + $0x250] sm:$0xff]  ;;  %v228_v39 = vld [vmem:[%s933_s25 + $0x258] sm:$0xff] }
  0x22   : > { %221 = vst [vmem:[%s941_s26 + $0x118] sm:$0xff] %v220_v35  ;;  %223 = vst [vmem:[%s941_s26 + $0x120] sm:$0xff] %v222_v36 }
  0x23   : > { %225 = vst [vmem:[%s941_s26 + $0x128] sm:$0xff] %v224_v37  ;;  %227 = vst [vmem:[%s941_s26 + $0x130] sm:$0xff] %v226_v38 }
  0x24   : > { %229 = vst [vmem:[%s941_s26 + $0x138] sm:$0xff] %v228_v39 }
  0x25 PF: > { %p774_p5 = scmp.ge.s32.totalorder %s876_s14, 1  ;;  %p234_p6 = scmp.lt.s32.totalorder %s876_s14, 3 }
  0x27   : > { %p235_p7 = pnand %p774_p5, %p234_p6 }
  0x28   : > { %s241_s27 = sand.u32 (!%p235_p7), 1, %s868_s12   ;;  %s775_s7 = sshll.u32 (!%p235_p7), %s768_s15, 1 }
  0x29   : > { %238 = sbr.rel (%p235_p7) target bundleno = 297 (0x129), region = 51  ;;  %p266_p8 = scmp.lt.s32.totalorder (!%p235_p7), %s775_s7, 3 }
  0x2a   : > { %s827_s28 = smul.u32 (!%p235_p7), 320, %s241_s27 }
  0x2c   : > { %s1026_s4 = scalar_lea.vmem (!%p235_p7), [#allocation2], %s827_s28 }
  0x2e   : > { %v878_v40 = vmov 0   ;;  %v687_v41 = vld [vmem:[%s1094_s2] sm:$0x3f]  ;;  %v306_v44 = vld [vmem:[%s1026_s4 + $0x108] sm:$0xff]  ;;  %v307_v16 = vld [vmem:[%s1026_s4 + $0x110] sm:$0xff]  ;;  %vm513_vm0 = vcmask 654336  }
  0x2f   : > { %549 = vmatprep.mubr.bf16.mxu0 %v878_v40  ;;  %590 = vmatprep.mubr.bf16.mxu1 %v878_v40  ;;  %v305_v42 = vld [vmem:[%s1026_s4 + $0x100] sm:$0xff]  ;;  %v310_v46 = vld [vmem:[%s1026_s4 + $0x128] sm:$0xff]  ;;  %v311_v17 = vld [vmem:[%s1026_s4 + $0x130] sm:$0xff]  ;;  %s1100_s7 = smov (!%p266_p8, %s775_s7), 3 }
  0x30   : > { %853 = vset.pattern.permute.xlu0 %v878_v40  ;;  %v309_v43 = vld [vmem:[%s1026_s4 + $0x120] sm:$0xff]  ;;  %v812_v50 = vcombine.high %v306_v44, %v310_v46  ;;  %v811_v51 = vcombine.low %v306_v44, %v310_v46  ;;  %v298_v53 = vld [vmem:[%s1026_s4 + $0xc8] sm:$0xff]  ;;  %v308_v18 = vld [vmem:[%s1026_s4 + $0x118] sm:$0xff]  ;;  %v814_v22 = vcombine.high %v307_v16, %v311_v17  ;;  %v813_v29 = vcombine.low %v307_v16, %v311_v17  ;;  %s776_s8 = sshll.u32 %s1100_s7, 2 }
  0x31   : > { %690 = vperm.xlu0 %853, %v687_v41   ;;  %v810_v45 = vcombine.high %v305_v42, %v309_v43  ;;  %v809_v47 = vcombine.low %v305_v42, %v309_v43  ;;  %v297_v48 = vld [vmem:[%s1026_s4 + $0xc0] sm:$0xff]  ;;  %v302_v54 = vld [vmem:[%s1026_s4 + $0xe8] sm:$0xff]  ;;  %v312_v19 = vld [vmem:[%s1026_s4 + $0x138] sm:$0xff]  ;;  %s269_s11 = scalar_lea.vmem %s1095_s3, %s776_s8 }
  0x32   : > { %v301_v49 = vld [vmem:[%s1026_s4 + $0xe0] sm:$0xff]  ;;  %v804_v56 = vcombine.high %v298_v53, %v302_v54  ;;  %v290_v58 = vld [vmem:[%s1026_s4 + $0x88] sm:$0xff]  ;;  %564 = vmatprep.subr.bf16.mxu1 %v812_v50  ;;  %v803_v61 = vcombine.low %v298_v53, %v302_v54  ;;  %v816_v23 = vcombine.high %v308_v18, %v312_v19  ;;  %v299_v24 = vld [vmem:[%s1026_s4 + $0xd0] sm:$0xff]  ;;  %v815_v30 = vcombine.low %v308_v18, %v312_v19 }
  0x33   : > { %v802_v52 = vcombine.high %v297_v48, %v301_v49  ;;  %v289_v55 = vld [vmem:[%s1026_s4 + $0x80] sm:$0xff]  ;;  %523 = vmatprep.subr.bf16.mxu0 %v810_v45  ;;  %v294_v59 = vld [vmem:[%s1026_s4 + $0xa8] sm:$0xff]  ;;  %v801_v60 = vcombine.low %v297_v48, %v301_v49  ;;  %565 = vmatpush1.bf16.msra.mxu1 %v811_v51  ;;  %v303_v25 = vld [vmem:[%s1026_s4 + $0xf0] sm:$0xff] }
  0x34   : > { %v293_v57 = vld [vmem:[%s1026_s4 + $0xa0] sm:$0xff]  ;;  %524 = vmatpush1.bf16.msra.mxu0 %v809_v47  ;;  %566 = vmatprep.subr.bf16.mxu1 %v804_v56  ;;  %v796_v63 = vcombine.high %v290_v58, %v294_v59  ;;  %v282_v2 = vld [vmem:[%s1026_s4 + $0x48] sm:$0xff]  ;;  %v795_v5 = vcombine.low %v290_v58, %v294_v59  ;;  %v300_v26 = vld [vmem:[%s1026_s4 + $0xd8] sm:$0xff]  ;;  %v806_v31 = vcombine.high %v299_v24, %v303_v25 }
  0x35   : > { %525 = vmatprep.subr.bf16.mxu0 %v802_v52  ;;  %v794_v62 = vcombine.high %v289_v55, %v293_v57  ;;  %v281_v0 = vld [vmem:[%s1026_s4 + $0x40] sm:$0xff]  ;;  %v286_v3 = vld [vmem:[%s1026_s4 + $0x68] sm:$0xff]  ;;  %v793_v4 = vcombine.low %v289_v55, %v293_v57  ;;  %v304_v27 = vld [vmem:[%s1026_s4 + $0xf8] sm:$0xff]  ;;  %v805_v37 = vcombine.low %v299_v24, %v303_v25 }
  0x36   : > { %v285_v1 = vld [vmem:[%s1026_s4 + $0x60] sm:$0xff]  ;;  %v788_v7 = vcombine.high %v282_v2, %v286_v3  ;;  %v274_v10 = vld [vmem:[%s1026_s4 + $0x8] sm:$0xff]  ;;  %v787_v13 = vcombine.low %v282_v2, %v286_v3  ;;  %v808_v32 = vcombine.high %v300_v26, %v304_v27  ;;  %v291_v33 = vld [vmem:[%s1026_s4 + $0x90] sm:$0xff]  ;;  %v807_v38 = vcombine.low %v300_v26, %v304_v27 }
  0x37   : > { %567 = vmatpush1.bf16.msra.mxu1 %v803_v61  ;;  %v786_v6 = vcombine.high %v281_v0, %v285_v1  ;;  %v273_v8 = vld [vmem:[%s1026_s4] sm:$0xff]  ;;  %v278_v11 = vld [vmem:[%s1026_s4 + $0x28] sm:$0xff]  ;;  %v785_v12 = vcombine.low %v281_v0, %v285_v1  ;;  %v295_v34 = vld [vmem:[%s1026_s4 + $0xb0] sm:$0xff] }
  0x38   : > { %526 = vmatpush1.bf16.msra.mxu0 %v801_v60  ;;  %568 = vmatprep.subr.bf16.mxu1 %v796_v63  ;;  %v277_v9 = vld [vmem:[%s1026_s4 + $0x20] sm:$0xff]  ;;  %v780_v15 = vcombine.high %v274_v10, %v278_v11  ;;  %v779_v21 = vcombine.low %v274_v10, %v278_v11  ;;  %v292_v35 = vld [vmem:[%s1026_s4 + $0x98] sm:$0xff]  ;;  %v798_v39 = vcombine.high %v291_v33, %v295_v34  ;;  %v283_v42 = vld [vmem:[%s1026_s4 + $0x50] sm:$0xff] }
  0x39   : > { %527 = vmatprep.subr.bf16.mxu0 %v794_v62  ;;  %v778_v14 = vcombine.high %v273_v8, %v277_v9  ;;  %v777_v20 = vcombine.low %v273_v8, %v277_v9  ;;  %v272_v28 = vld [vmem:[%s1093_s1] sm:$0x7]  ;;  %v296_v36 = vld [vmem:[%s1026_s4 + $0xb8] sm:$0xff]  ;;  %v287_v43 = vld [vmem:[%s1026_s4 + $0x70] sm:$0xff]  ;;  %v797_v46 = vcombine.low %v291_v33, %v295_v34 }
  0x3a   : > { %v800_v41 = vcombine.high %v292_v35, %v296_v36  ;;  %v284_v44 = vld [vmem:[%s1026_s4 + $0x58] sm:$0xff]  ;;  %v799_v47 = vcombine.low %v292_v35, %v296_v36  ;;  %v790_v48 = vcombine.high %v283_v42, %v287_v43  ;;  %v275_v50 = vld [vmem:[%s1026_s4 + $0x10] sm:$0xff]  ;;  %v789_v54 = vcombine.low %v283_v42, %v287_v43 }
  0x3b   : > { %569 = vmatpush1.bf16.msra.mxu1 %v795_v5  ;;  %v288_v45 = vld [vmem:[%s1026_s4 + $0x78] sm:$0xff]  ;;  %v279_v51 = vld [vmem:[%s1026_s4 + $0x30] sm:$0xff] }
  0x3c   : > { %528 = vmatpush1.bf16.msra.mxu0 %v793_v4  ;;  %570 = vmatprep.subr.bf16.mxu1 %v788_v7  ;;  %v792_v49 = vcombine.high %v284_v44, %v288_v45  ;;  %v276_v52 = vld [vmem:[%s1026_s4 + $0x18] sm:$0xff]  ;;  %v791_v55 = vcombine.low %v284_v44, %v288_v45  ;;  %v782_v56 = vcombine.high %v275_v50, %v279_v51 }
  0x3d   : > { %529 = vmatprep.subr.bf16.mxu0 %v786_v6  ;;  %v280_v53 = vld [vmem:[%s1026_s4 + $0x38] sm:$0xff]  ;;  %v781_v57 = vcombine.low %v275_v50, %v279_v51 }
  0x3e   : > { %v783_v58 = vcombine.low %v276_v52, %v280_v53 }
  0x3f   : > { %571 = vmatpush1.bf16.msra.mxu1 %v787_v13 }
  0x40   : > { %530 = vmatpush1.bf16.msra.mxu0 %v785_v12  ;;  %572 = vmatprep.subr.bf16.mxu1 %v780_v15 }
  0x41   : > { %531 = vmatprep.subr.bf16.mxu0 %v778_v14 }
  0x43   : > { %573 = vmatpush1.bf16.msra.mxu1 %v779_v21 }
  0x44   : > { %532 = vmatpush1.bf16.msra.mxu0 %v777_v20  ;;  %646 = vmatprep.subr.bf16.mxu1 %v816_v23 }
  0x45   : > { %605 = vmatprep.subr.bf16.mxu0 %v814_v22 }
  0x46   : > { %818 = vmatmul.mubr.msk.bf16.vlgmr.msra.gmra.mxu1 %vm513_vm0, %v272_v28 }
  0x47   : > { %817 = vmatmul.mubr.msk.bf16.vlgmr.msra.gmra.mxu0 %vm513_vm0, %v272_v28  ;;  %647 = vmatpush1.bf16.msra.mxu1 %v815_v30 }
  0x48   : > { %606 = vmatpush1.bf16.msra.mxu0 %v813_v29  ;;  %648 = vmatprep.subr.bf16.mxu1 %v808_v32 }
  0x49   : > { %607 = vmatprep.subr.bf16.mxu0 %v806_v31  ;;  %631 = vmatprep.mubr.bf16.mxu0 %v878_v40 }
  0x4a   : > { %672 = vmatprep.mubr.bf16.mxu1 %v878_v40  ;;  %v784_v40 = vcombine.high %v276_v52, %v280_v53 }
  0x4b   : > { %649 = vmatpush1.bf16.msra.mxu1 %v807_v38 }
  0x4c   : > { %608 = vmatpush1.bf16.msra.mxu0 %v805_v37  ;;  %650 = vmatprep.subr.bf16.mxu1 %v800_v41 }
  0x4d   : > { %609 = vmatprep.subr.bf16.mxu0 %v798_v39 }
  0x4f   : > { %651 = vmatpush1.bf16.msra.mxu1 %v799_v47 }
  0x50   : > { %610 = vmatpush1.bf16.msra.mxu0 %v797_v46  ;;  %652 = vmatprep.subr.bf16.mxu1 %v792_v49 }
  0x51   : > { %611 = vmatprep.subr.bf16.mxu0 %v790_v48 }
  0x53   : > { %653 = vmatpush1.bf16.msra.mxu1 %v791_v55 }
  0x54   : > { %612 = vmatpush1.bf16.msra.mxu0 %v789_v54  ;;  %654 = vmatprep.subr.bf16.mxu1 %v784_v40 }
  0x55   : > { %613 = vmatprep.subr.bf16.mxu0 %v782_v56 }
  0x57   : > { %655 = vmatpush1.bf16.msra.mxu1 %v783_v58 }
  0x58   : > { %614 = vmatpush1.bf16.msra.mxu0 %v781_v57 }
  0x5a   : > { %820 = vmatmul.mubr.msk.bf16.vlgmr.msra.gmra.mxu1 %vm513_vm0, %v272_v28 }
  0x5b   : > { %819 = vmatmul.mubr.msk.bf16.vlgmr.msra.gmra.mxu0 %vm513_vm0, %v272_v28 }
  0xac   : > { %v691_v9 = vpop.permute.xlu0 %690 }
 0x106   : > { %v592_v60 = vpop.f32.mrf.mxu1 }
 0x107   : > { %v551_v59 = vpop.f32.mrf.mxu0 }
 0x108   : > { %v594_v62 = vpop.f32.mrf.mxu1  ;;  %v681_v5 = vmax.f32 %v551_v59, %v592_v60 }
 0x109   : > { %v553_v61 = vpop.f32.mrf.mxu0 }
 0x10a   : > { %v596_v0 = vpop.f32.mrf.mxu1  ;;  %v682_v10 = vmax.f32 %v553_v61, %v594_v62 }
 0x10b   : > { %v555_v63 = vpop.f32.mrf.mxu0 }
 0x10c   : > { %v597_v2 = vpop.f32.mrf.mxu1 }
 0x10d   : > { %v556_v1 = vpop.f32.mrf.mxu0 }
 0x11a   : > { %v674_v4 = vpop.f32.mrf.mxu1 }
 0x11b   : > { %v633_v3 = vpop.f32.mrf.mxu0 }
 0x11c   : > { %v683_v6 = vmax.f32 %v633_v3, %v674_v4  ;;  %v676_v8 = vpop.f32.mrf.mxu1 }
 0x11d   : > { %v635_v7 = vpop.f32.mrf.mxu0 }
 0x11e   : > { %v684_v11 = vmax.f32 %v635_v7, %v676_v8  ;;  %v685_v12 = vmax.f32 %v681_v5, %v683_v6  ;;  %v678_v14 = vpop.f32.mrf.mxu1 }
 0x11f   : > { %v637_v13 = vpop.f32.mrf.mxu0 }
 0x120   : > { %v686_v15 = vmax.f32 %v682_v10, %v684_v11  ;;  %v693_v16 = vadd.f32 %v691_v9, %v685_v12  ;;  %v679_v18 = vpop.f32.mrf.mxu1 }
 0x121   : > { %v638_v17 = vpop.f32.mrf.mxu0 }
 0x122   : > { %v694_v19 = vadd.f32 %v691_v9, %v686_v15  ;;  %v695_v20 = vmax.f32 %v693_v16, 0.0 }
 0x124   : > { %v696_v21 = vmax.f32 %v694_v19, 0.0 }
 0x126   : > { %v825_v22 = vpack.c.bf16 %v696_v21, %v695_v20 }
 0x128   : > { %705 = vst [vmem:[%s269_s11] sm:$0x77] %v825_v22 }
 0x129 PF: > { %p10_p9 = scmp.ge.s32.totalorder %s916_s16, 4   ;;  %s1096_s12 = smov %s872_s13 }
 0x12a   : > { %s1097_s13 = smov %s925_s19  ;;  %s1098_s14 = smov %s916_s16 }
 0x12b   :  { %12 = sbr.rel (!%p10_p9) target bundleno = 2 (0x2), region = 90 }

// kernel: net_forward.4
= control target key start
LH: loop header
LB: loop body
LE: loop exit
PB: predicated region body
PF: predicated region fallthrough
CT: control target
= control target key end

     0   :  { %v510_v1 = vmov 0   ;;  %vm266_vm0 = vcmask 261120   ;;  %s666_s0 = inlined_call_operand.vmem [shape: bf16[160,512], index: 0, kind: input, shape index: {}]   ;;  %s667_s1 = inlined_call_operand.vmem [shape: bf16[16,160], index: 1, kind: input, shape index: {}]   ;;  %s668_s2 = inlined_call_operand.vmem [shape: f32[16,1], index: 2, kind: input, shape index: {}]   ;;  %s669_s3 = inlined_call_operand.vmem [shape: bf16[16,128], index: 3, kind: output, shape index: {}]  }
   0x1   :  { %v447_v0 = vld [vmem:[%s666_s0 + $0xe4] ss:$16 sps:$4 sm:$0xff]   ;;  %446 = vset.pattern.permute.xlu0 %v510_v1  ;;  %v449_v2 = vld [vmem:[%s666_s0 + $0xec] ss:$16 sps:$4 sm:$0xff]   ;;  %v451_v3 = vld [vmem:[%s666_s0 + $0xe0] ss:$16 sps:$4 sm:$0xff]  }
   0x2   :  { %270 = vmatprep.subr.bf16.mxu0 %v447_v0  ;;  %v452_v4 = vld [vmem:[%s666_s0 + $0xe8] ss:$16 sps:$4 sm:$0xff]   ;;  %313 = vmatprep.subr.bf16.mxu1 %v449_v2  ;;  %v453_v5 = vld [vmem:[%s666_s0 + $0xc4] ss:$16 sps:$4 sm:$0xff]   ;;  %v455_v6 = vld [vmem:[%s666_s0 + $0xcc] ss:$16 sps:$4 sm:$0xff]  }
   0x3   :  { %271 = vmatpush1.bf16.msra.mxu0 %v451_v3  ;;  %314 = vmatpush1.bf16.msra.mxu1 %v452_v4  ;;  %v457_v7 = vld [vmem:[%s666_s0 + $0xc0] ss:$16 sps:$4 sm:$0xff]   ;;  %v458_v8 = vld [vmem:[%s666_s0 + $0xc8] ss:$16 sps:$4 sm:$0xff]   ;;  %v459_v9 = vld [vmem:[%s666_s0 + $0xa4] ss:$16 sps:$4 sm:$0xff]  }
   0x4   :  { %272 = vmatprep.subr.bf16.mxu0 %v453_v5  ;;  %315 = vmatprep.subr.bf16.mxu1 %v455_v6  ;;  %v461_v10 = vld [vmem:[%s666_s0 + $0xac] ss:$16 sps:$4 sm:$0xff]   ;;  %v463_v11 = vld [vmem:[%s666_s0 + $0xa0] ss:$16 sps:$4 sm:$0xff]   ;;  %v464_v12 = vld [vmem:[%s666_s0 + $0xa8] ss:$16 sps:$4 sm:$0xff]  }
   0x5   :  { %v465_v13 = vld [vmem:[%s666_s0 + $0x84] ss:$16 sps:$4 sm:$0xff]   ;;  %v467_v14 = vld [vmem:[%s666_s0 + $0x8c] ss:$16 sps:$4 sm:$0xff]   ;;  %v469_v15 = vld [vmem:[%s666_s0 + $0x80] ss:$16 sps:$4 sm:$0xff]  }
   0x6   :  { %v470_v16 = vld [vmem:[%s666_s0 + $0x88] ss:$16 sps:$4 sm:$0xff]   ;;  %v471_v17 = vld [vmem:[%s666_s0 + $0x64] ss:$16 sps:$4 sm:$0xff]   ;;  %v473_v18 = vld [vmem:[%s666_s0 + $0x6c] ss:$16 sps:$4 sm:$0xff]  }
   0x7   :  { %273 = vmatpush1.bf16.msra.mxu0 %v457_v7  ;;  %316 = vmatpush1.bf16.msra.mxu1 %v458_v8  ;;  %v475_v19 = vld [vmem:[%s666_s0 + $0x60] ss:$16 sps:$4 sm:$0xff]   ;;  %v476_v20 = vld [vmem:[%s666_s0 + $0x68] ss:$16 sps:$4 sm:$0xff]   ;;  %v477_v21 = vld [vmem:[%s666_s0 + $0x44] ss:$16 sps:$4 sm:$0xff]  }
   0x8   :  { %274 = vmatprep.subr.bf16.mxu0 %v459_v9  ;;  %317 = vmatprep.subr.bf16.mxu1 %v461_v10  ;;  %v479_v22 = vld [vmem:[%s666_s0 + $0x4c] ss:$16 sps:$4 sm:$0xff]   ;;  %v481_v23 = vld [vmem:[%s666_s0 + $0x40] ss:$16 sps:$4 sm:$0xff]   ;;  %v482_v24 = vld [vmem:[%s666_s0 + $0x48] ss:$16 sps:$4 sm:$0xff]  }
   0x9   :  { %v483_v25 = vld [vmem:[%s666_s0 + $0x24] ss:$16 sps:$4 sm:$0xff]   ;;  %v485_v26 = vld [vmem:[%s666_s0 + $0x2c] ss:$16 sps:$4 sm:$0xff]   ;;  %v487_v27 = vld [vmem:[%s666_s0 + $0x20] ss:$16 sps:$4 sm:$0xff]  }
   0xa   :  { %v488_v28 = vld [vmem:[%s666_s0 + $0x28] ss:$16 sps:$4 sm:$0xff]   ;;  %v489_v29 = vld [vmem:[%s666_s0 + $0x4] ss:$16 sps:$4 sm:$0xff]   ;;  %v491_v30 = vld [vmem:[%s666_s0 + $0xc] ss:$16 sps:$4 sm:$0xff]  }
   0xb   :  { %275 = vmatpush1.bf16.msra.mxu0 %v463_v11  ;;  %318 = vmatpush1.bf16.msra.mxu1 %v464_v12  ;;  %v509_v31 = vld [vmem:[%s667_s1 + $0x4] ss:$8 sps:$4 sm:$0xff]   ;;  %v493_v32 = vld [vmem:[%s666_s0] ss:$16 sps:$4 sm:$0xff]   ;;  %v494_v33 = vld [vmem:[%s666_s0 + $0x8] ss:$16 sps:$4 sm:$0xff]  }
   0xc   :  { %276 = vmatprep.subr.bf16.mxu0 %v465_v13  ;;  %319 = vmatprep.subr.bf16.mxu1 %v467_v14  ;;  %v362_v34 = vld [vmem:[%s668_s2] sm:$0xff]  ;;  %v497_v36 = vld [vmem:[%s666_s0 + $0x12c] ss:$16 sps:$4 sm:$0xff]   ;;  %v500_v38 = vld [vmem:[%s666_s0 + $0x128] ss:$16 sps:$4 sm:$0xff]  }
   0xd   :  { %v495_v35 = vld [vmem:[%s666_s0 + $0x124] ss:$16 sps:$4 sm:$0xff]   ;;  %434 = vmatprep.mubr.msk.bf16.mxu0 %vm266_vm0, %v509_v31  ;;  %435 = vmatprep.mubr.msk.bf16.mxu1 %vm266_vm0, %v509_v31  ;;  %v499_v37 = vld [vmem:[%s666_s0 + $0x120] ss:$16 sps:$4 sm:$0xff]   ;;  %v363_v39 = vld [vmem:[%s668_s2 + $0x8] sm:$0xff] }
   0xe   :  { %366 = vperm.xlu0 %446, %v362_v34   ;;  %v501_v40 = vld [vmem:[%s666_s0 + $0x104] ss:$16 sps:$4 sm:$0xff]   ;;  %v503_v41 = vld [vmem:[%s666_s0 + $0x10c] ss:$16 sps:$4 sm:$0xff]   ;;  %v505_v42 = vld [vmem:[%s666_s0 + $0x100] ss:$16 sps:$4 sm:$0xff]  }
   0xf   :  { %277 = vmatpush1.bf16.msra.mxu0 %v469_v15  ;;  %320 = vmatpush1.bf16.msra.mxu1 %v470_v16  ;;  %v506_v43 = vld [vmem:[%s666_s0 + $0x108] ss:$16 sps:$4 sm:$0xff]  }
  0x10   :  { %278 = vmatprep.subr.bf16.mxu0 %v471_v17  ;;  %321 = vmatprep.subr.bf16.mxu1 %v473_v18  ;;  %v507_v44 = vld [vmem:[%s667_s1] ss:$8 sps:$4 sm:$0xff]  }
  0x12   :  { %371 = vperm.xlu0 %446, %v363_v39  }
  0x13   :  { %279 = vmatpush1.bf16.msra.mxu0 %v475_v19  ;;  %322 = vmatpush1.bf16.msra.mxu1 %v476_v20 }
  0x14   :  { %280 = vmatprep.subr.bf16.mxu0 %v477_v21  ;;  %323 = vmatprep.subr.bf16.mxu1 %v479_v22 }
  0x17   :  { %281 = vmatpush1.bf16.msra.mxu0 %v481_v23  ;;  %324 = vmatpush1.bf16.msra.mxu1 %v482_v24 }
  0x18   :  { %282 = vmatprep.subr.bf16.mxu0 %v483_v25  ;;  %325 = vmatprep.subr.bf16.mxu1 %v485_v26 }
  0x1b   :  { %283 = vmatpush1.bf16.msra.mxu0 %v487_v27  ;;  %326 = vmatpush1.bf16.msra.mxu1 %v488_v28 }
  0x1c   :  { %284 = vmatprep.subr.bf16.mxu0 %v489_v29  ;;  %327 = vmatprep.subr.bf16.mxu1 %v491_v30 }
  0x1f   :  { %285 = vmatpush1.bf16.msra.mxu0 %v493_v32  ;;  %328 = vmatpush1.bf16.msra.mxu1 %v494_v33 }
  0x20   :  { %298 = vmatprep.subr.bf16.mxu0 %v495_v35  ;;  %341 = vmatprep.subr.bf16.mxu1 %v497_v36 }
  0x23   :  { %299 = vmatpush2.bf16.msra.mxu0 %v499_v37  ;;  %342 = vmatpush2.bf16.msra.mxu1 %v500_v38 }
  0x24   :  { %300 = vmatprep.subr.bf16.mxu0 %v501_v40  ;;  %343 = vmatprep.subr.bf16.mxu1 %v503_v41 }
  0x27   :  { %301 = vmatpush2.bf16.msra.mxu0 %v505_v42  ;;  %344 = vmatpush2.bf16.msra.mxu1 %v506_v43 }
  0x2a   :  { %303 = vmatmul.mubr.bf16.vlgmr.msra.gmra.mxu0 %v507_v44  ;;  %346 = vmatmul.mubr.bf16.vlgmr.msra.gmra.mxu1 %v507_v44 }
  0x89   :  { %v367_v49 = vpop.permute.xlu0 %366 }
  0x8d   :  { %v372_v61 = vpop.permute.xlu0 %371 }
  0xea   :  { %v304_v45 = vpop.f32.mrf.mxu0  ;;  %v347_v46 = vpop.f32.mrf.mxu1 }
  0xec   :  { %v306_v47 = vpop.f32.mrf.mxu0  ;;  %v349_v48 = vpop.f32.mrf.mxu1 }
  0xed   :  { %v356_v50 = vmax.f32 %v304_v45, %v306_v47  ;;  %v358_v51 = vmax.f32 %v347_v46, %v349_v48 }
  0xee   :  { %v308_v52 = vpop.f32.mrf.mxu0  ;;  %v351_v53 = vpop.f32.mrf.mxu1 }
  0xef   :  { %v360_v54 = vmax.f32 %v356_v50, %v358_v51 }
  0xf0   :  { %v310_v55 = vpop.f32.mrf.mxu0  ;;  %v353_v56 = vpop.f32.mrf.mxu1 }
  0xf1   :  { %v357_v57 = vmax.f32 %v308_v52, %v310_v55  ;;  %v359_v58 = vmax.f32 %v351_v53, %v353_v56  ;;  %v374_v59 = vadd.f32 %v367_v49, %v360_v54 }
  0xf3   :  { %v361_v60 = vmax.f32 %v357_v57, %v359_v58  ;;  %v376_v63 = vmax.f32 %v374_v59, 0.0 }
  0xf5   :  { %v375_v62 = vadd.f32 %v372_v61, %v361_v60 }
  0xf7   :  { %v377_v0 = vmax.f32 %v375_v62, 0.0 }
  0xf9   :  { %v443_v1 = vpack.c.bf16 %v377_v0, %v376_v63 }
  0xfb   :  { %444 = vst [vmem:[%s669_s3] sm:$0xff] %v443_v1  }

// kernel: net_forward.5
= control target key start
LH: loop header
LB: loop body
LE: loop exit
PB: predicated region body
PF: predicated region fallthrough
CT: control target
= control target key end

     0   :  { %v783_v1 = vmov 0   ;;  %v98_v20 = vlaneseq  ;;  %v784_v25 = vmov 1966171168   ;;  %vm264_vm0 = vcmask 130048   ;;  %s993_s0 = inlined_call_operand.vmem [shape: bf16[2,400], index: 0, kind: input, shape index: {}]   ;;  %s994_s1 = inlined_call_operand.vmem [shape: bf16[400,128], index: 1, kind: input, shape index: {}]   ;;  %s995_s2 = inlined_call_operand.vmem [shape: f32[1,128], index: 2, kind: input, shape index: {}]   ;;  %s996_s3 = inlined_call_operand.vmem [shape: bf16[128,128], index: 3, kind: input, shape index: {}]   ;;  %s997_s4 = inlined_call_operand.vmem [shape: f32[1,128], index: 4, kind: input, shape index: {}]   ;;  %s998_s5 = inlined_call_operand.vmem [shape: bf16[128,128], index: 5, kind: input, shape index: {}]   ;;  %s999_s6 = inlined_call_operand.vmem [shape: f32[1,128], index: 6, kind: input, shape index: {}]   ;;  %s1000_s7 = inlined_call_operand.hbm [shape: f32[2,128], index: 7, kind: output, shape index: {}]  }
   0x1   :  { %v720_v0 = vld [vmem:[%s994_s1 + $0x78] sm:$0xff]   ;;  %308 = vmatprep.subr.bf16.mxu1 %v783_v1  ;;  %v723_v4 = vld [vmem:[%s994_s1 + $0x70] sm:$0xff]   ;;  %v726_v7 = vld [vmem:[%s994_s1 + $0x68] sm:$0xff]   ;;  %v96_v26 = vunpack.c.l.s4 %v784_v25  ;;  %v785_v38 = vmov 0.0  }
   0x2   :  { %v721_v2 = vld [vmem:[%s994_s1 + $0xb8] sm:$0xff]   ;;  %635 = vmatprep.subr.bf16.mxu0 %v720_v0  ;;  %v724_v5 = vld [vmem:[%s994_s1 + $0xb0] sm:$0xff]   ;;  %v727_v8 = vld [vmem:[%s994_s1 + $0xa8] sm:$0xff]   ;;  %v99_v27 = vshrl.u32 %v98_v20, 7 }
   0x3   :  { %v722_v3 = vld [vmem:[%s994_s1 + $0x38] sm:$0xff]   ;;  %309 = vmatpush1.bf16.msra.mxu1 %v721_v2  ;;  %v725_v6 = vld [vmem:[%s994_s1 + $0x30] sm:$0xff]   ;;  %v728_v9 = vld [vmem:[%s994_s1 + $0x28] sm:$0xff]   ;;  %v97_v30 = vunpack.c.0.s8 %v96_v26 }
   0x4   :  { %636 = vmatpush3.bf16.msra.mxu0 %v722_v3  ;;  %310 = vmatprep.subr.bf16.mxu1 %v783_v1  ;;  %v729_v10 = vld [vmem:[%s994_s1 + $0x60] sm:$0xff]   ;;  %v732_v13 = vld [vmem:[%s994_s1 + $0x58] sm:$0xff]   ;;  %v735_v16 = vld [vmem:[%s994_s1 + $0x50] sm:$0xff]  }
   0x5   :  { %637 = vmatprep.subr.bf16.mxu0 %v723_v4  ;;  %v730_v11 = vld [vmem:[%s994_s1 + $0xa0] sm:$0xff]   ;;  %v733_v14 = vld [vmem:[%s994_s1 + $0x98] sm:$0xff]   ;;  %v736_v17 = vld [vmem:[%s994_s1 + $0x90] sm:$0xff]   ;;  %v100_v32 = vsub.s32 %v97_v30, %v99_v27 }
   0x6   :  { %v731_v12 = vld [vmem:[%s994_s1 + $0x20] sm:$0xff]   ;;  %v734_v15 = vld [vmem:[%s994_s1 + $0x18] sm:$0xff]   ;;  %v737_v18 = vld [vmem:[%s994_s1 + $0x10] sm:$0xff]  }
   0x7   :  { %311 = vmatpush1.bf16.msra.mxu1 %v724_v5  ;;  %v738_v19 = vld [vmem:[%s994_s1 + $0x48] sm:$0xff]   ;;  %v590_v23 = vld.sshfl [vmem:[%s993_s0] sm:$0x33 pattern:$0x75316420]  ;;  %v745_v34 = vld [vmem:[%s996_s3 + $0x38] sm:$0xff]  }
   0x8   :  { %638 = vmatpush3.bf16.msra.mxu0 %v725_v6  ;;  %312 = vmatprep.subr.bf16.mxu1 %v783_v1  ;;  %v739_v21 = vld [vmem:[%s994_s1 + $0x88] sm:$0xff]   ;;  %v741_v24 = vld [vmem:[%s994_s1 + $0x40] sm:$0xff]   ;;  %v94_v29 = vcombine.high %v590_v23, %v590_v23  ;;  %v101_v36 = vrot.slane %v590_v23, %v100_v32  ;;  %v746_v40 = vld [vmem:[%s996_s3 + $0x30] sm:$0xff]  }
   0x9   :  { %639 = vmatprep.subr.bf16.mxu0 %v726_v7  ;;  %v740_v22 = vld [vmem:[%s994_s1 + $0x8] sm:$0xff]   ;;  %v742_v28 = vld [vmem:[%s994_s1 + $0x80] sm:$0xff]  }
   0xa   :  { %v743_v31 = vld [vmem:[%s994_s1] sm:$0xff]   ;;  %v108_v35 = vrot.slane %v94_v29, %v100_v32  ;;  %v109_v39 = vcombine.high %v101_v36, %v101_v36 }
   0xb   :  { %313 = vmatpush1.bf16.msra.mxu1 %v727_v8  ;;  %v744_v33 = vld [vmem:[%s994_s1 + $0xc0] sm:$0xff]  }
   0xc   :  { %640 = vmatpush3.bf16.msra.mxu0 %v728_v9  ;;  %314 = vmatprep.subr.bf16.mxu1 %v783_v1  ;;  %v110_v37 = vcombine.high %v108_v35, %v108_v35 }
   0xd   :  { %641 = vmatprep.subr.bf16.mxu0 %v729_v10  ;;  %300 = vmatprep.mubr.bf16.mxu0 %v108_v35 }
   0xe   :  { %616 = vmatprep.mubr.msk.bf16.mxu1 %vm264_vm0, %v110_v37 }
   0xf   :  { %315 = vmatpush1.bf16.msra.mxu1 %v730_v11 }
  0x10   :  { %642 = vmatpush3.bf16.msra.mxu0 %v731_v12  ;;  %316 = vmatprep.subr.bf16.mxu1 %v783_v1 }
  0x11   :  { %643 = vmatprep.subr.bf16.mxu0 %v732_v13 }
  0x13   :  { %317 = vmatpush1.bf16.msra.mxu1 %v733_v14 }
  0x14   :  { %644 = vmatpush3.bf16.msra.mxu0 %v734_v15  ;;  %318 = vmatprep.subr.bf16.mxu1 %v783_v1 }
  0x15   :  { %645 = vmatprep.subr.bf16.mxu0 %v735_v16 }
  0x17   :  { %319 = vmatpush1.bf16.msra.mxu1 %v736_v17 }
  0x18   :  { %646 = vmatpush3.bf16.msra.mxu0 %v737_v18  ;;  %320 = vmatprep.subr.bf16.mxu1 %v783_v1 }
  0x19   :  { %647 = vmatprep.subr.bf16.mxu0 %v738_v19 }
  0x1b   :  { %321 = vmatpush1.bf16.msra.mxu1 %v739_v21 }
  0x1c   :  { %648 = vmatpush3.bf16.msra.mxu0 %v740_v22  ;;  %322 = vmatprep.subr.bf16.mxu1 %v783_v1 }
  0x1d   :  { %649 = vmatprep.subr.bf16.mxu0 %v741_v24 }
  0x1f   :  { %323 = vmatpush1.bf16.msra.mxu1 %v742_v28 }
  0x20   :  { %650 = vmatpush3.bf16.msra.mxu0 %v743_v31  ;;  %338 = vmatprep.subr.bf16.mxu1 %v783_v1 }
  0x21   :  { %675 = vmatprep.subr.bf16.mxu0 %v785_v38 }
  0x23   :  { %301 = vmatmul.mubr.bf16.vlgmr.msra.gmra.mxu0 %v101_v36  ;;  %339 = vmatpush2.bf16.msra.mxu1 %v744_v33 }
  0x24   :  { %676 = vmatpush3.bf16.msra.mxu0 %v745_v34  ;;  %695 = vmatprep.subr.bf16.mxu1 %v785_v38 }
  0x25   :  { %677 = vmatprep.subr.bf16.mxu0 %v785_v38 }
  0x26   :  { %341 = vmatmul.mubr.bf16.vlgmr.msra.gmra.mxu1 %v109_v39 }
  0x27   :  { %12 = vsyncpa [#allocation3], 0  ;;  %v747_v41 = vld [vmem:[%s996_s3 + $0x28] sm:$0xff]   ;;  %v748_v42 = vld [vmem:[%s996_s3 + $0x20] sm:$0xff]   ;;  %vm786_vm1 = vmmov 0   ;;  %s787_s16 = smov [#allocation2]  }
  0x28   :  { %678 = vmatpush3.bf16.msra.mxu0 %v746_v40  ;;  %v749_v43 = vld [vmem:[%s996_s3 + $0x18] sm:$0xff]   ;;  %v750_v44 = vld [vmem:[%s996_s3 + $0x10] sm:$0xff]   ;;  %v751_v45 = vld [vmem:[%s996_s3 + $0x8] sm:$0xff]   ;;  %691 = vmatprep.mubr.msk.bf16.mxu0 %vm786_vm1, %v785_v38  ;;  %s581_s17 = sshll.u32 %s787_s16, 4  ;;  %s582_s17 = int_to_ptr.vmem [resolvable:$true] %s581_s17 }
  0x29   :  { %679 = vmatprep.subr.bf16.mxu0 %v785_v38  ;;  %v752_v46 = vld [vmem:[%s996_s3] sm:$0xff]   ;;  %711 = vmatprep.mubr.msk.bf16.mxu1 %vm786_vm1, %v785_v38  ;;  %v753_v47 = vld [vmem:[%s998_s5 + $0x38] sm:$0xff]   ;;  %v754_v48 = vld [vmem:[%s998_s5 + $0x30] sm:$0xff]   ;;  %p766_p1 = scmp.lt.s32.totalorder %s582_s17, %s582_s17 }
  0x2a   :  { %696 = vmatpush3.bf16.msra.mxu1 %v753_v47  ;;  %v755_v49 = vld [vmem:[%s998_s5 + $0x28] sm:$0xff]   ;;  %v756_v50 = vld [vmem:[%s998_s5 + $0x20] sm:$0xff]   ;;  %v757_v51 = vld [vmem:[%s998_s5 + $0x18] sm:$0xff]  }
  0x2b   :  { %697 = vmatprep.subr.bf16.mxu1 %v785_v38  ;;  %v758_v52 = vld [vmem:[%s998_s5 + $0x10] sm:$0xff]   ;;  %v589_v55 = vld [vmem:[%s995_s2] ss:$0 sm:$0xff]  ;;  %v759_v3 = vld [vmem:[%s998_s5 + $0x8] sm:$0xff]  }
  0x2c   :  { %680 = vmatpush3.bf16.msra.mxu0 %v747_v41  ;;  %v760_v4 = vld [vmem:[%s998_s5] sm:$0xff]  }
  0x2d   :  { %681 = vmatprep.subr.bf16.mxu0 %v785_v38  ;;  %v617_v5 = vld [vmem:[%s997_s4] ss:$0 sm:$0xff]  ;;  %s761_s4 = scalar_lea.vmem %s582_s17, 32 }
  0x2e   :  { %698 = vmatpush3.bf16.msra.mxu1 %v754_v48  ;;  %v626_v13 = vld [vmem:[%s999_s6] ss:$0 sm:$0xff]  ;;  %p762_p0 = scmp.ne.s32.totalorder %s582_s17, %s761_s4  ;;  %p767_p2 = scmp.lt.s32.totalorder %s761_s4, %s761_s4 }
  0x2f   :  { %699 = vmatprep.subr.bf16.mxu1 %v785_v38 }
  0x30   :  { %682 = vmatpush3.bf16.msra.mxu0 %v748_v42  ;;  %p768_p3 = por %p767_p2, %p766_p1 }
  0x31   :  { %683 = vmatprep.subr.bf16.mxu0 %v785_v38 }
  0x32   :  { %700 = vmatpush3.bf16.msra.mxu1 %v755_v49  ;;  %p769_p4 = pnand %p768_p3, %p762_p0 }
  0x33   :  { %701 = vmatprep.subr.bf16.mxu1 %v785_v38 }
  0x34   :  { %684 = vmatpush3.bf16.msra.mxu0 %v749_v43 }
  0x35   :  { %685 = vmatprep.subr.bf16.mxu0 %v785_v38 }
  0x36   :  { %702 = vmatpush3.bf16.msra.mxu1 %v756_v50 }
  0x37   :  { %703 = vmatprep.subr.bf16.mxu1 %v785_v38 }
  0x38   :  { %686 = vmatpush3.bf16.msra.mxu0 %v750_v44 }
  0x39   :  { %687 = vmatprep.subr.bf16.mxu0 %v785_v38 }
  0x3a   :  { %704 = vmatpush3.bf16.msra.mxu1 %v757_v51 }
  0x3b   :  { %705 = vmatprep.subr.bf16.mxu1 %v785_v38 }
  0x3c   :  { %688 = vmatpush3.bf16.msra.mxu0 %v751_v45 }
  0x3d   :  { %689 = vmatprep.subr.bf16.mxu0 %v785_v38 }
  0x3e   :  { %706 = vmatpush3.bf16.msra.mxu1 %v758_v52 }
  0x3f   :  { %707 = vmatprep.subr.bf16.mxu1 %v785_v38 }
  0x40   :  { %690 = vmatpush3.bf16.msra.mxu0 %v752_v46 }
  0x42   :  { %708 = vmatpush3.bf16.msra.mxu1 %v759_v3 }
  0x43   :  { %709 = vmatprep.subr.bf16.mxu1 %v785_v38 }
  0x46   :  { %710 = vmatpush3.bf16.msra.mxu1 %v760_v4 }
  0xe3   :  { %v651_v53 = vpop.f32.mrf.mxu0 }
  0xe5   :  { %v652_v54 = vpop.f32.mrf.mxu0 }
  0xe6   :  { %v653_v56 = vadd.f32 %v652_v54, %v651_v53  ;;  %v342_v57 = vpop.f32.mrf.mxu1 }
  0xe7   :  { %v654_v58 = vpop.f32.mrf.mxu0 }
  0xe8   :  { %v303_v59 = vadd.f32 %v653_v56, %v589_v55  ;;  %v344_v60 = vpop.f32.mrf.mxu1 }
  0xe9   :  { %v655_v61 = vpop.f32.mrf.mxu0 }
  0xea   :  { %v343_v62 = vadd.f32 %v342_v57, %v303_v59  ;;  %v345_v63 = vpop.f32.mrf.mxu1 }
  0xec   :  { %v348_v0 = vmax.f32 %v343_v62, 0.0  ;;  %v346_v1 = vpop.f32.mrf.mxu1 }
  0xee   :  { %v349_v2 = vpack.c.bf16 %v348_v0, %v348_v0 }
  0xf0   :  { %692 = vmatmul.mubr.bf16.vlgmr.msra.gmra.mxu0 %v349_v2 }
 0x1b0   :  { %v455_v6 = vpop.f32.mrf.mxu0 }
 0x1b1   :  { %v456_v7 = vadd.f32 %v617_v5, %v455_v6 }
 0x1b2   :  { %v693_v8 = vpop.f32.mrf.mxu0 }
 0x1b3   :  { %v461_v9 = vmax.f32 %v456_v7, 0.0 }
 0x1b4   :  { %v458_v10 = vpop.f32.mrf.mxu0 }
 0x1b5   :  { %v462_v11 = vpack.c.bf16 %v461_v9, %v461_v9 }
 0x1b6   :  { %v694_v12 = vpop.f32.mrf.mxu0 }
 0x1b7   :  { %712 = vmatmul.mubr.bf16.vlgmr.msra.gmra.mxu1 %v462_v11 }
 0x277   :  { %v568_v14 = vpop.f32.mrf.mxu1 }
 0x278   :  { %v569_v15 = vadd.f32 %v626_v13, %v568_v14 }
 0x279   :  { %v713_v16 = vpop.f32.mrf.mxu1 }
 0x27a   :  { %574 = vst [vmem:[#allocation2] sm:$0x3] %v569_v15 }
 0x27b   :  { %v571_v17 = vpop.f32.mrf.mxu1 }
 0x27c   :  { %772 = shalt.err (!%p769_p4)
}
 0x27d   :  { %584 = dma.vmem_to_hbm [thread:$0]  %s582_s17, 32, %s1000_s7, [#allocation3]   ;;  %v714_v18 = vpop.f32.mrf.mxu1 }
 0x27e   :  { %781 = dma.done.wait [#allocation3], 32  }
 0x27f   :  { %782 = vsyncadd [#allocation3], 4294967264 }
 0x280   :  { %588 = vsyncpa [#allocation3], 1 }

</bundles_post_ra>
